<compile_context>
chip_gen: v6e
topology: v6e:2x2x1
jax: 0.10.0
libtpu: 0.0.40
codegen_flags: <defaults>
</compile_context>

<pallas_src>
import jax
import jax.numpy as jnp
from jax.experimental import pallas as pl
from jax.experimental.pallas import tpu as pltpu

_LANE = 128
_SUBLANE = 8


def _stochdepth_kernel(mask_ref, x_ref, o_ref):
    # mask_ref: (B,) int32 in SMEM (scalar prefetch) -- 0 or 1 per sample.
    b = pl.program_id(0)
    o_ref[...] = x_ref[...] * mask_ref[b].astype(o_ref.dtype)


def stoch_depth(x, stochdepth_rate: float, seed: int = 0, training: bool = True):
    """Pallas StochDepth forward. x: (B, C, H, W) (any trailing dims work)."""
    if not training or stochdepth_rate == 0.0:
        return x

    orig_shape = x.shape
    B = orig_shape[0]
    keep_prob = 1.0 - float(stochdepth_rate)

    # Per-sample binary mask, exactly the PyTorch formula:
    #   floor(U[0,1) + keep_prob) in {0, 1}
    key = jax.random.PRNGKey(seed)
    u = jax.random.uniform(key, (B,), dtype=jnp.float32)
    mask = jnp.floor(u + jnp.float32(keep_prob)).astype(jnp.int32)

    # ---- lane-dense layout: (B, F) -> (B, rows, 128), rows multiple of 8 ----
    F = 1
    for d in orig_shape[1:]:
        F *= int(d)

    rows = -(-F // _LANE)                                   # ceil(F / 128)
    rows = ((rows + _SUBLANE - 1) // _SUBLANE) * _SUBLANE   # round up to 8

    # ~1 MiB per (double-buffered) block, safe on every generation.
    itemsize = jnp.dtype(x.dtype).itemsize
    target_rows = max(_SUBLANE, (1 << 20) // (_LANE * itemsize))
    target_rows = (target_rows // _SUBLANE) * _SUBLANE
    tile_rows = min(rows, target_rows)
    rows = ((rows + tile_rows - 1) // tile_rows) * tile_rows  # tile_rows | rows
    F_pad = rows * _LANE

    xf = x.reshape(B, F)
    if F_pad != F:
        xf = jnp.pad(xf, ((0, 0), (0, F_pad - F)))
    x3 = xf.reshape(B, rows, _LANE)

    grid = (B, rows // tile_rows)
    grid_spec = pltpu.PrefetchScalarGridSpec(
        num_scalar_prefetch=1,  # per-sample keep bits land in SMEM
        grid=grid,
        in_specs=[
            pl.BlockSpec((1, tile_rows, _LANE), lambda b, r, mask_ref: (b, r, 0)),
        ],
        out_specs=pl.BlockSpec((1, tile_rows, _LANE), lambda b, r, mask_ref: (b, r, 0)),
    )

    out3 = pl.pallas_call(
        _stochdepth_kernel,
        out_shape=jax.ShapeDtypeStruct((B, rows, _LANE), x.dtype),
        grid_spec=grid_spec,
        compiler_params=pltpu.CompilerParams(
            # No stateful PRNG in the kernel -> every step is order-independent,
            # so both axes can shard across TensorCores (helps v7x, neutral elsewhere).
            dimension_semantics=("parallel", "parallel"),
        ),
    )(mask, x3)

    out = out3.reshape(B, F_pad)
    if F_pad != F:
        out = out[:, :F]
    return out.reshape(orig_shape)


if __name__ == "__main__":
    key = jax.random.PRNGKey(0)
    x = jax.random.normal(key, (2, 4, 16, 16), dtype=jnp.float32)

    stochdepth_rate = 0.5
    out = stoch_depth(x, stochdepth_rate, seed=0, training=True)
    out = jax.block_until_ready(out)

    # Sanity: every sample is either untouched or fully zeroed.
    for b in range(x.shape[0]):
        same = bool(jnp.allclose(out[b], x[b]))
        zero = bool(jnp.allclose(out[b], 0.0))
        assert same or zero, "per-sample mask must be 0 or 1"

    # Eval mode is identity.
    out_eval = jax.block_until_ready(stoch_depth(x, stochdepth_rate, training=False))
    assert bool(jnp.allclose(out_eval, x))

    print("KERNEL_OK")
</pallas_src>

<mosaic_0001>
module attributes {stable_mosaic.version = 11 : i64} {
  func.func @_stochdepth_kernel(%arg0: i32, %arg1: i32, %arg2: memref<2xi32, #tpu.memory_space<smem>>, %arg3: memref<1x8x128xf32, #tpu.memory_space<vmem>>, %arg4: memref<1x8x128xf32, #tpu.memory_space<vmem>>) attributes {dimension_semantics = [#tpu.dimension_semantics<parallel>, #tpu.dimension_semantics<parallel>], iteration_bounds = array<i64: 2, 1>, scalar_prefetch = 1 : i64, scratch_operands = 0 : i64, tpu.core_type = #tpu.core_type<tc>, window_params = [{transform_indices = @transform_0, window_bounds = array<i64: 1, 8, 128>}, {transform_indices = @transform_1, window_bounds = array<i64: 1, 8, 128>}]} {
    %c0 = arith.constant 0 : index
    %c0_0 = arith.constant 0 : index
    %c0_1 = arith.constant 0 : index
    %0 = vector.load %arg3[%c0, %c0_0, %c0_1] : memref<1x8x128xf32, #tpu.memory_space<vmem>>, vector<1x8x128xf32>
    %1 = arith.index_cast %arg0 : i32 to index
    %2 = memref.load %arg2[%1] : memref<2xi32, #tpu.memory_space<smem>>
    %3 = arith.sitofp %2 : i32 to f32
    %4 = vector.broadcast %3 : f32 to vector<1x8x128xf32>
    %5 = arith.mulf %0, %4 : vector<1x8x128xf32>
    %c0_2 = arith.constant 0 : index
    %c0_3 = arith.constant 0 : index
    %c0_4 = arith.constant 0 : index
    %6 = vector.load %arg4[%c0_2, %c0_3, %c0_4] : memref<1x8x128xf32, #tpu.memory_space<vmem>>, vector<1x8x128xf32>
    tpu.vector_store %arg4[%c0_2, %c0_3, %c0_4], %5 {strides = array<i32>} : memref<1x8x128xf32, #tpu.memory_space<vmem>>, vector<1x8x128xf32>,
    return
  }
  func.func @transform_0(%arg0: i32, %arg1: i32, %arg2: memref<2xi32, #tpu.memory_space<smem>>) -> (i32, i32, i32) {
    %c0_i32 = arith.constant 0 : i32
    %c0_i32_0 = arith.constant 0 : i32
    return %arg0, %arg1, %c0_i32 : i32, i32, i32
  }
  func.func @transform_1(%arg0: i32, %arg1: i32, %arg2: memref<2xi32, #tpu.memory_space<smem>>) -> (i32, i32, i32) {
    %c0_i32 = arith.constant 0 : i32
    %c0_i32_0 = arith.constant 0 : i32
    return %arg0, %arg1, %c0_i32 : i32, i32, i32
  }
}

</mosaic_0001>

<bundles_post_ra>
// kernel: tpu_custom_call.1
= control target key start
LH: loop header
LB: loop body
LE: loop exit
PB: predicated region body
PF: predicated region fallthrough
CT: control target
= control target key end

     0   :  { %s451_s9 = smov [#allocation3]   ;;  %s607_s0 = inlined_call_operand.hbm [shape: s32[2], index: 0, kind: input, shape index: {}]   ;;  %s608_s1 = inlined_call_operand.hbm [shape: f32[2,8,128], index: 1, kind: input, shape index: {}]   ;;  %s609_s2 = inlined_call_operand.hbm [shape: f32[2,8,128], index: 2, kind: output, shape index: {}]  }
   0x1   :  { %8 = dma.hbm_to_smem %s607_s0, 16, %s451_s9, [#allocation2] }
   0x2   :  { %417 = dma.done.wait [#allocation2], 16 }
   0x3   :  { %418 = vsyncadd [#allocation2], 4294967280 }
   0x4   :  { %10 = sfence }
   0x5   :  { %11 = vsyncpa [#allocation5], 0 }
   0x6   :  { %13 = vsyncpa [#allocation5 + $0x1], 0 }
   0x7   :  { %14 = vsyncpa [#allocation6], 0 }
   0x8   :  { %16 = vsyncpa [#allocation6 + $0x1], 0  ;;  %s472_s12 = smov 0   ;;  %s474_s13 = smov 0  }
   0x9   :  { %s476_s14 = smov 0   ;;  %s478_s15 = smov 0  }
   0xa   :  { %s480_s16 = smov 0   ;;  %s482_s17 = smov 0  }
   0xb LB: > { %s255_s0 = sadd.s32 4294967295, %s449_s17   ;;  %s256_s18 = sadd.s32 4294967294, %s449_s17   ;;  %s449_s17 = sphi %s482_s17, %s22_s17   ;;  %s445_s16 = sphi %s480_s16, %s621_s16   ;;  %s441_s15 = sphi %s478_s15, %s620_s15   ;;  %s437_s14 = sphi %s476_s14, %s619_s14   ;;  %s433_s13 = sphi %s474_s13, %s618_s13   ;;  %s429_s12 = sphi %s472_s12, %s617_s12  }
   0xc   : > { %s34_s19 = sadd.s32 1, %s445_s16  ;;  %s43_s20 = sadd.s32 1, %s437_s14 }
   0xd   : > { %p36_p0 = scmp.ge.s32.totalorder %s34_s19, 2  ;;  %p50_p1 = scmp.ne.s32.totalorder %s437_s14, %s433_s13 }
   0xe   : > { %p51_p2 = scmp.eq.s32.totalorder %s449_s17, 0  ;;  %p56_p3 = scmp.ne.s32.totalorder %s433_s13, %s429_s12 }
   0xf   : > { %s623_s19 = smov (%p36_p0, %s34_s19), 0  ;;  %p57_p5 = scmp.eq.s32.totalorder %s255_s0, 0 }
  0x10   : > { %p513_p4 = por %p51_p2, %p50_p1  ;;  %s38_s22 = ssub.s32 %s445_s16, %s623_s19 }
  0x11   : > { %p82_p6 = scmp.eq.s32.totalorder %s255_s0, 1  ;;  %p41_p7 = scmp.eq.s32.totalorder %s38_s22, 0 }
  0x12   : > { %p519_p8 = por %p57_p5, %p56_p3  ;;  %p88_p10 = scmp.eq.s32.totalorder %s256_s18, 1 }
  0x13   : > { %p523_p9 = por %p82_p6, %p50_p1  ;;  %p280_p13 = scmp.lt.s32.totalorder %s449_s17, 2 }
  0x14   : > { %s528_s25 = scalar_select %p41_p7, %s437_s14, %s43_s20  }
  0x15   : > { %p530_p11 = por %p88_p10, %p56_p3  ;;  %s108_s27 = sand.u32 1, %s437_s14  }
  0x16   : > { %s259_s28 = sshll.u32 %s108_s27, 3  ;;  %s260_s29 = sshll.u32 %s445_s16, 7 }
  0x17   : > { %s613_s26 = scalar_select %p530_p11, 1, 0 }
  0x18   : > { %s118_s4 = scalar_lea.hbm %s608_s1, %s260_s29  ;;  %s112_s5 = scalar_lea.vmem [#allocation4], %s259_s28 }
  0x19   : > { %s120_s6 = sshll.u32 %s112_s5, 4  ;;  %p543_p0 = pnand %p280_p13, %p513_p4  ;;  %s121_s6 = int_to_ptr.vmem [resolvable:$true] %s120_s6 }
  0x1a   : > { %p261_p1 = scmp.ge.s32.totalorder %s449_s17, 1  ;;  %p125_p2 = scmp.lt.s32.totalorder %s449_s17, 3 }
  0x1b   : > { %s109_s8 = scalar_lea.sflag [#allocation5], %s108_s27  ;;  %p341_p3 = pneg %p543_p0 }
  0x1c   : > { %s352_s9 = scalar_lea.vmem %s121_s6, 128  ;;  %s452_s10 = smov [#allocation4]  }
  0x1d   : > { %p353_p5 = scmp.ne.s32.totalorder %s121_s6, %s352_s9  ;;  %s357_s11 = sshll.u32 %s452_s10, 4  ;;  %s358_s11 = int_to_ptr.vmem [resolvable:$false] %s357_s11 }
  0x1e   : > { %s359_s0 = scalar_lea.vmem %s358_s11, 256  ;;  %p360_p10 = scmp.lt.s32.totalorder %s121_s6, %s358_s11 }
  0x1f   : > { %p355_p6 = pnand %p353_p5, %p341_p3  ;;  %p361_p12 = scmp.lt.s32.totalorder %s359_s0, %s352_s9 }
  0x21   : > { %p356_p7 = pneg %p355_p6  ;;  %p362_p4 = por %p361_p12, %p360_p10 }
  0x23   : > { %p363_p13 = pnand %p362_p4, %p356_p7 }
  0x25   : > { %366 = shalt.err (!%p363_p13)
}
  0x26   : > { %275 = dma.hbm_to_vmem [thread:$0]  (!%p543_p0), %s118_s4, 128, %s121_s6, %s109_s8  }
  0x27   : > { %p126_p11 = pnand %p261_p1, %p125_p2 }
  0x28   : > { %s558_s18 = sand.u32 (!%p126_p11), 1, %s433_s13  }
  0x29   : > { %129 = sbr.rel (%p126_p11) target bundleno = 72 (0x48), region = 24  ;;  %s262_s20 = sshll.u32 (!%p126_p11), %s558_s18, 3 }
  0x2a   : > { %s132_s21 = scalar_lea.sflag (!%p126_p11), [#allocation5], %s558_s18  ;;  %s135_s22 = scalar_lea.vmem (!%p126_p11), [#allocation4], %s262_s20 }
  0x2e   : > { %420 = dma.done.wait (%p519_p8), %s132_s21, 128  }
  0x2f   : > { %422 = vsyncadd (%p519_p8), %s132_s21, 4294967168  ;;  %s155_s27 = sld [smem:[#allocation3 + %s441_s15]]  ;;  %s153_s28 = scalar_lea.vmem [#allocation7], %s262_s20  ;;  %v154_v0 = vld [vmem:[%s135_s22] sm:$0xff] }
  0x30   : > { %s175_s29 = sshll.u32 %s153_s28, 4  ;;  %s265_s3 = sshll.u32 %s441_s15, 7  ;;  %s176_s29 = int_to_ptr.vmem [resolvable:$true] %s175_s29 }
  0x31   : > { %s173_s6 = scalar_lea.hbm %s609_s2, %s265_s3  ;;  %s161_s23 = scalar_lea.sflag [#allocation6], %s558_s18 }
  0x32   : > { %s367_s7 = scalar_lea.vmem %s176_s29, 128  ;;  %s453_s8 = smov [#allocation7]  }
  0x33   : > { %p368_p8 = scmp.ne.s32.totalorder %s176_s29, %s367_s7  ;;  %s371_s9 = sshll.u32 %s453_s8, 4  ;;  %s372_s9 = int_to_ptr.vmem [resolvable:$false] %s371_s9 }
  0x34   : > { %s373_s10 = scalar_lea.vmem %s372_s9, 256  ;;  %p374_p0 = scmp.lt.s32.totalorder %s176_s29, %s372_s9 }
  0x35   : > { %s156_s30 = scvt.s32.f32 %s155_s27  ;;  %p369_p11 = pnand %p368_p8, %p523_p9 }
  0x36   : > { %p375_p1 = scmp.lt.s32.totalorder %s373_s10, %s367_s7 }
  0x37   : > { %v157_v1 = vstv %s156_s30  ;;  %p370_p12 = pneg %p369_p11 }
  0x38   : > { %v158_v2 = vmul.f32 %v157_v1, %v154_v0  ;;  %p376_p2 = por %p375_p1, %p374_p0 }
  0x3a   : > { %159 = vst [vmem:[%s153_s28] sm:$0xff] %v158_v2  ;;  %p377_p3 = pnand %p376_p2, %p370_p12 }
  0x3c   : > { %380 = shalt.err (!%p377_p3)
}
  0x3d   : > { %s381_s15 = scalar_lea.hbm %s173_s6, 128  ;;  %s385_s18 = scalar_lea.hbm %s609_s2, 256 }
  0x3e   : > { %p382_p5 = scmp.ne.s32.totalorder %s173_s6, %s381_s15  ;;  %p386_p10 = scmp.lt.s32.totalorder %s173_s6, %s609_s2 }
  0x3f   : > { %p387_p4 = scmp.lt.s32.totalorder %s385_s18, %s381_s15 }
  0x40   : > { %p383_p6 = pnand %p382_p5, %p523_p9 }
  0x41   : > { %p388_p13 = por %p387_p4, %p386_p10 }
  0x42   : > { %p384_p7 = pneg %p383_p6 }
  0x44   : > { %p389_p8 = pnand %p388_p13, %p384_p7 }
  0x46   : > { %392 = shalt.err (!%p389_p8)
}
  0x47   : > { %270 = dma.vmem_to_hbm [thread:$0]  (%p523_p9), %s176_s29, 128, %s173_s6, %s161_s23  }
  0x48 PF: > { %s187_s22 = sand.u32 1, %s429_s12   ;;  %p615_p11 = scmp.ne.s32.totalorder %s613_s26, 0 }
  0x49   : > { %p616_p12 = scmp.ge.s32.totalorder %s449_s17, 2  ;;  %s188_s27 = scalar_lea.sflag [#allocation6], %s187_s22 }
  0x4b   : > { %p277_p0 = pnand %p616_p12, %p615_p11 }
  0x4d   : > { %p278_p1 = pneg %p277_p0 }
  0x4f   : > { %424 = dma.done.wait (%p278_p1), %s188_s27, 128  }
  0x50   : > { %426 = vsyncadd (%p278_p1), %s188_s27, 4294967168  ;;  %s22_s17 = sadd.s32 1, %s449_s17   ;;  %s617_s12 = smov %s433_s13 }
  0x51   : > { %p19_p2 = scmp.ge.s32.totalorder %s22_s17, 4   ;;  %s618_s13 = smov %s437_s14 }
  0x52   : > { %s619_s14 = smov %s528_s25  ;;  %s620_s15 = smov %s445_s16 }
  0x53   : > { %s621_s16 = smov %s623_s19  ;;  %21 = sbr.rel (!%p19_p2) target bundleno = 11 (0xb), region = 69 }
  0x58   :  { %193 = vsyncpa [#allocation5], 1 }
  0x59   :  { %195 = vsyncpa [#allocation5 + $0x1], 1 }
  0x5a   :  { %196 = vsyncpa [#allocation6], 1 }
  0x5b   :  { %198 = vsyncpa [#allocation6 + $0x1], 1 }

</bundles_post_ra>
